<compile_context>
chip_gen: v6e
topology: v6e:2x2x1
jax: 0.10.0
libtpu: 0.0.40
codegen_flags: <defaults>
</compile_context>

<pallas_src>
import functools

import jax
import jax.numpy as jnp
from jax.experimental import pallas as pl
from jax.experimental.pallas import tpu as pltpu


def _round_up(n, m):
    return ((n + m - 1) // m) * m


# ----------------------------- Pallas kernel ------------------------------- #
def vae_kernel(x_ref, eps_ref,
               w1_ref, b1_ref, w2_ref, b2_ref,
               wh_ref, bh_ref,
               w3_ref, b3_ref, w4_ref, b4_ref,
               out_ref, *, lat_pad, in_pad):
    cdt = w1_ref.dtype                       # bf16 compute dtype for MXU inputs
    x = x_ref[...]                           # [bb, IN_P] bf16

    # Encoder: Linear(88->mid)+ReLU, Linear(mid->latent)+ReLU
    h1 = jnp.dot(x, w1_ref[...], preferred_element_type=jnp.float32) + b1_ref[...]
    h1 = jnp.maximum(h1, 0.0)
    enc = jnp.dot(h1.astype(cdt), w2_ref[...],
                  preferred_element_type=jnp.float32) + b2_ref[...]
    enc = jnp.maximum(enc, 0.0)

    # Fused mu / log_var head: one matmul into [bb, 2*LAT_P].
    head = jnp.dot(enc.astype(cdt), wh_ref[...],
                   preferred_element_type=jnp.float32) + bh_ref[...]
    mu = head[:, :lat_pad]
    lv = head[:, lat_pad:]

    # Reparameterize: z = mu + eps * exp(0.5 * log_var)   (f32 elementwise, EUP exp)
    z = mu + eps_ref[...] * jnp.exp(0.5 * lv)

    # Decoder: Linear(latent->mid)+ReLU, Linear(mid->88)+Sigmoid
    h2 = jnp.dot(z.astype(cdt), w3_ref[...],
                 preferred_element_type=jnp.float32) + b3_ref[...]
    h2 = jnp.maximum(h2, 0.0)
    dec = jnp.dot(h2.astype(cdt), w4_ref[...],
                  preferred_element_type=jnp.float32) + b4_ref[...]
    dec = jax.nn.sigmoid(dec)

    # Pack outputs into one lane-dense slab: [enc | mu | lv | dec].
    # All column offsets are multiples of 128 -> unmasked full-width stores;
    # mu|lv are written together as one 2*LAT_P-wide store.
    out_ref[:, 0 * lat_pad:1 * lat_pad] = enc
    out_ref[:, 1 * lat_pad:3 * lat_pad] = head
    out_ref[:, 3 * lat_pad:3 * lat_pad + in_pad] = dec


# ------------------------------- Wrapper ------------------------------------ #
@functools.partial(jax.jit, static_argnames=("block_b",))
def vae_forward(x, eps, packed, block_b=512):
    """Fused VAE forward.

    x:      [B, in_dim]    float32
    eps:    [B, latent]    float32 standard-normal noise (randn_like)
    packed: dict of padded bf16 weights [in_pad, out_pad] and f32 biases
            [1, out_pad] from pack_params().
    Returns (encoded, decoded, mu, log_var) with original (unpadded) dims.
    """
    B, in_dim = x.shape
    lat = eps.shape[1]
    cdt = packed["w1"].dtype
    IN_P = packed["w1"].shape[0]
    LAT_P = packed["w2"].shape[1]
    slab_w = 3 * LAT_P + IN_P

    # Effective row tile: whole (8-rounded) batch if small, else block_b.
    bb = min(_round_up(block_b, 8), _round_up(B, 8))
    B_pad = _round_up(B, bb)
    grid = (B_pad // bb,)

    # Zero-pad batch and feature dims; cast activations to bf16 for the MXU.
    xp = jnp.zeros((B_pad, IN_P), cdt).at[:B, :in_dim].set(x.astype(cdt))
    epsp = jnp.zeros((B_pad, LAT_P), jnp.float32).at[:B, :lat].set(eps)

    def row_spec(feat):
        return pl.BlockSpec((bb, feat), lambda i: (i, 0))

    def whole_spec(arr):
        # Weights/biases are tiny; constant block index -> resident in VMEM
        # across every grid step (no re-DMA).
        return pl.BlockSpec(arr.shape, lambda i: (0,) * arr.ndim)

    in_specs = [
        row_spec(IN_P),             # x
        row_spec(LAT_P),            # eps
        whole_spec(packed["w1"]), whole_spec(packed["b1"]),
        whole_spec(packed["w2"]), whole_spec(packed["b2"]),
        whole_spec(packed["wh"]), whole_spec(packed["bh"]),
        whole_spec(packed["w3"]), whole_spec(packed["b3"]),
        whole_spec(packed["w4"]), whole_spec(packed["b4"]),
    ]
    out_specs = pl.BlockSpec((bb, slab_w), lambda i: (i, 0))
    out_shape = jax.ShapeDtypeStruct((B_pad, slab_w), jnp.float32)

    kernel = functools.partial(vae_kernel, lat_pad=LAT_P, in_pad=IN_P)

    slab = pl.pallas_call(
        kernel,
        out_shape=out_shape,
        grid_spec=pltpu.PrefetchScalarGridSpec(
            num_scalar_prefetch=0,
            grid=grid,
            in_specs=in_specs,
            out_specs=out_specs,
        ),
        compiler_params=pltpu.CompilerParams(
            dimension_semantics=("parallel",)),
    )(xp, epsp,
      packed["w1"], packed["b1"], packed["w2"], packed["b2"],
      packed["wh"], packed["bh"],
      packed["w3"], packed["b3"], packed["w4"], packed["b4"])

    # Split the lane-dense slab back into the logical outputs (static slices).
    enc = slab[:B, 0 * LAT_P:0 * LAT_P + lat]
    mu = slab[:B, 1 * LAT_P:1 * LAT_P + lat]
    lv = slab[:B, 2 * LAT_P:2 * LAT_P + lat]
    dec = slab[:B, 3 * LAT_P:3 * LAT_P + in_dim]
    return enc, dec, mu, lv


# ------------------------ Parameter init / packing --------------------------- #
def init_params(key, in_dim=88, mid_layer=32, latent_dim=16):
    """Deterministic synthetic weights; Linear stored transposed as [in, out]."""
    def linear(k, fan_in, fan_out):
        kw, kb = jax.random.split(k)
        bound = 1.0 / jnp.sqrt(fan_in)
        w = jax.random.uniform(kw, (fan_in, fan_out), jnp.float32, -bound, bound)
        b = jax.random.uniform(kb, (1, fan_out), jnp.float32, -bound, bound)
        return w, b

    keys = jax.random.split(key, 6)
    w1, b1 = linear(keys[0], in_dim, mid_layer)       # encoder[0]
    w2, b2 = linear(keys[1], mid_layer, latent_dim)   # encoder[2]
    wmu, bmu = linear(keys[2], latent_dim, latent_dim)
    wlv, blv = linear(keys[3], latent_dim, latent_dim)
    w3, b3 = linear(keys[4], latent_dim, mid_layer)   # decoder[0]
    w4, b4 = linear(keys[5], mid_layer, in_dim)       # decoder[2]
    return dict(w1=w1, b1=b1, w2=w2, b2=b2, wmu=wmu, bmu=bmu,
                wlv=wlv, blv=blv, w3=w3, b3=b3, w4=w4, b4=b4)


def pack_params(p, compute_dtype=jnp.bfloat16):
    """Zero-pad every feature dim to a multiple of 128, fuse mu/log_var heads,
    cast weights (MXU inputs) to bf16; biases stay f32."""
    in_dim, mid = p["w1"].shape
    lat = p["wmu"].shape[0]
    IN_P, MID_P, LAT_P = (_round_up(d, 128) for d in (in_dim, mid, lat))

    def pad_w(w, rows, cols):
        return jnp.zeros((rows, cols), jnp.float32).at[:w.shape[0], :w.shape[1]].set(w)

    def pad_b(b, cols):
        return jnp.zeros((1, cols), jnp.float32).at[:, :b.shape[1]].set(b)

    wh = jnp.concatenate([pad_w(p["wmu"], LAT_P, LAT_P),
                          pad_w(p["wlv"], LAT_P, LAT_P)], axis=1)   # [LAT_P, 2*LAT_P]
    bh = jnp.concatenate([pad_b(p["bmu"], LAT_P),
                          pad_b(p["blv"], LAT_P)], axis=1)          # [1, 2*LAT_P]

    return dict(
        w1=pad_w(p["w1"], IN_P, MID_P).astype(compute_dtype), b1=pad_b(p["b1"], MID_P),
        w2=pad_w(p["w2"], MID_P, LAT_P).astype(compute_dtype), b2=pad_b(p["b2"], LAT_P),
        wh=wh.astype(compute_dtype), bh=bh,
        w3=pad_w(p["w3"], LAT_P, MID_P).astype(compute_dtype), b3=pad_b(p["b3"], MID_P),
        w4=pad_w(p["w4"], MID_P, IN_P).astype(compute_dtype), b4=pad_b(p["b4"], IN_P),
    )


# ------------------------------ Reference ----------------------------------- #
def vae_ref(x, eps, p):
    h1 = jnp.maximum(x @ p["w1"] + p["b1"], 0.0)
    enc = jnp.maximum(h1 @ p["w2"] + p["b2"], 0.0)
    mu = enc @ p["wmu"] + p["bmu"]
    lv = enc @ p["wlv"] + p["blv"]
    z = mu + eps * jnp.exp(0.5 * lv)
    h2 = jnp.maximum(z @ p["w3"] + p["b3"], 0.0)
    dec = jax.nn.sigmoid(h2 @ p["w4"] + p["b4"])
    return enc, dec, mu, lv


if __name__ == "__main__":
    key = jax.random.PRNGKey(0)
    k_params, k_x, k_eps, k_x2, k_eps2 = jax.random.split(key, 5)

    in_dim, mid_layer, latent_dim = 88, 32, 16
    params = init_params(k_params, in_dim, mid_layer, latent_dim)
    packed = pack_params(params)

    # bf16 MXU inputs (f32 accumulation) vs. pure-f32 reference -> loose tol.
    tol = dict(atol=3e-2, rtol=3e-2)

    # Small batch: whole batch handled in a single grid step.
    batch = 8
    x = jax.random.normal(k_x, (batch, in_dim), jnp.float32)
    eps = jax.random.normal(k_eps, (batch, latent_dim), jnp.float32)
    enc, dec, mu, lv = vae_forward(x, eps, packed)
    jax.block_until_ready((enc, dec, mu, lv))

    enc_r, dec_r, mu_r, lv_r = vae_ref(x, eps, params)
    assert enc.shape == (batch, latent_dim) and dec.shape == (batch, in_dim)
    assert mu.shape == (batch, latent_dim) and lv.shape == (batch, latent_dim)
    assert jnp.allclose(enc, enc_r, **tol)
    assert jnp.allclose(dec, dec_r, **tol)
    assert jnp.allclose(mu, mu_r, **tol)
    assert jnp.allclose(lv, lv_r, **tol)

    # Larger, non-multiple batch: exercises cdiv grid + batch padding and the
    # 256-row tile path (megacore can shard the 4 grid steps on v7x).
    batch2 = 1000
    x2 = jax.random.normal(k_x2, (batch2, in_dim), jnp.float32)
    eps2 = jax.random.normal(k_eps2, (batch2, latent_dim), jnp.float32)
    enc2, dec2, mu2, lv2 = vae_forward(x2, eps2, packed, block_b=256)
    jax.block_until_ready((enc2, dec2, mu2, lv2))

    enc2_r, dec2_r, mu2_r, lv2_r = vae_ref(x2, eps2, params)
    assert jnp.allclose(enc2, enc2_r, **tol)
    assert jnp.allclose(dec2, dec2_r, **tol)
    assert jnp.allclose(mu2, mu2_r, **tol)
    assert jnp.allclose(lv2, lv2_r, **tol)

    print("KERNEL_OK")
</pallas_src>

<mosaic_0001>
module attributes {stable_mosaic.version = 11 : i64} {
  func.func @vae_kernel(%arg0: i32, %arg1: memref<8x128xbf16, #tpu.memory_space<vmem>>, %arg2: memref<8x128xf32, #tpu.memory_space<vmem>>, %arg3: memref<128x128xbf16, #tpu.memory_space<vmem>>, %arg4: memref<1x128xf32, #tpu.memory_space<vmem>>, %arg5: memref<128x128xbf16, #tpu.memory_space<vmem>>, %arg6: memref<1x128xf32, #tpu.memory_space<vmem>>, %arg7: memref<128x256xbf16, #tpu.memory_space<vmem>>, %arg8: memref<1x256xf32, #tpu.memory_space<vmem>>, %arg9: memref<128x128xbf16, #tpu.memory_space<vmem>>, %arg10: memref<1x128xf32, #tpu.memory_space<vmem>>, %arg11: memref<128x128xbf16, #tpu.memory_space<vmem>>, %arg12: memref<1x128xf32, #tpu.memory_space<vmem>>, %arg13: memref<8x512xf32, #tpu.memory_space<vmem>>) attributes {dimension_semantics = [#tpu.dimension_semantics<parallel>], iteration_bounds = array<i64: 1>, scalar_prefetch = 0 : i64, scratch_operands = 0 : i64, tpu.core_type = #tpu.core_type<tc>, window_params = [{transform_indices = @transform_0, window_bounds = array<i64: 8, 128>}, {transform_indices = @transform_1, window_bounds = array<i64: 8, 128>}, {pipeline_mode = #tpu.pipeline_mode<synchronous>, transform_indices = @transform_2, window_bounds = array<i64: 128, 128>}, {pipeline_mode = #tpu.pipeline_mode<synchronous>, transform_indices = @transform_3, window_bounds = array<i64: 1, 128>}, {pipeline_mode = #tpu.pipeline_mode<synchronous>, transform_indices = @transform_4, window_bounds = array<i64: 128, 128>}, {pipeline_mode = #tpu.pipeline_mode<synchronous>, transform_indices = @transform_5, window_bounds = array<i64: 1, 128>}, {pipeline_mode = #tpu.pipeline_mode<synchronous>, transform_indices = @transform_6, window_bounds = array<i64: 128, 256>}, {pipeline_mode = #tpu.pipeline_mode<synchronous>, transform_indices = @transform_7, window_bounds = array<i64: 1, 256>}, {pipeline_mode = #tpu.pipeline_mode<synchronous>, transform_indices = @transform_8, window_bounds = array<i64: 128, 128>}, {pipeline_mode = #tpu.pipeline_mode<synchronous>, transform_indices = @transform_9, window_bounds = array<i64: 1, 128>}, {pipeline_mode = #tpu.pipeline_mode<synchronous>, transform_indices = @transform_10, window_bounds = array<i64: 128, 128>}, {pipeline_mode = #tpu.pipeline_mode<synchronous>, transform_indices = @transform_11, window_bounds = array<i64: 1, 128>}, {transform_indices = @transform_12, window_bounds = array<i64: 8, 512>}]} {
    %c0 = arith.constant 0 : index
    %c0_0 = arith.constant 0 : index
    %0 = vector.load %arg1[%c0, %c0_0] : memref<8x128xbf16, #tpu.memory_space<vmem>>, vector<8x128xbf16>
    %c0_1 = arith.constant 0 : index
    %c0_2 = arith.constant 0 : index
    %1 = vector.load %arg3[%c0_1, %c0_2] : memref<128x128xbf16, #tpu.memory_space<vmem>>, vector<128x128xbf16>
    %cst = arith.constant dense<0.000000e+00> : vector<8x128xf32>
    %2 = tpu.matmul %0, %1, %cst {dimension_numbers = #tpu.dot_dimension_numbers<[1], [0], [0], [1], [0, 0, 1, 1], [], []>} : vector<8x128xbf16>, vector<128x128xbf16>, vector<8x128xf32> -> vector<8x128xf32>
    %c0_3 = arith.constant 0 : index
    %c0_4 = arith.constant 0 : index
    %3 = vector.load %arg4[%c0_3, %c0_4] : memref<1x128xf32, #tpu.memory_space<vmem>>, vector<1x128xf32>
    %4 = vector.broadcast %3 : vector<1x128xf32> to vector<8x128xf32>
    %5 = arith.addf %2, %4 : vector<8x128xf32>
    %cst_5 = arith.constant 0.000000e+00 : f32
    %6 = vector.broadcast %cst_5 : f32 to vector<8x128xf32>
    %7 = arith.maximumf %5, %6 : vector<8x128xf32>
    %8 = arith.truncf %7 : vector<8x128xf32> to vector<8x128xbf16>
    %c0_6 = arith.constant 0 : index
    %c0_7 = arith.constant 0 : index
    %9 = vector.load %arg5[%c0_6, %c0_7] : memref<128x128xbf16, #tpu.memory_space<vmem>>, vector<128x128xbf16>
    %cst_8 = arith.constant dense<0.000000e+00> : vector<8x128xf32>
    %10 = tpu.matmul %8, %9, %cst_8 {dimension_numbers = #tpu.dot_dimension_numbers<[1], [0], [0], [1], [0, 0, 1, 1], [], []>} : vector<8x128xbf16>, vector<128x128xbf16>, vector<8x128xf32> -> vector<8x128xf32>
    %c0_9 = arith.constant 0 : index
    %c0_10 = arith.constant 0 : index
    %11 = vector.load %arg6[%c0_9, %c0_10] : memref<1x128xf32, #tpu.memory_space<vmem>>, vector<1x128xf32>
    %12 = vector.broadcast %11 : vector<1x128xf32> to vector<8x128xf32>
    %13 = arith.addf %10, %12 : vector<8x128xf32>
    %cst_11 = arith.constant 0.000000e+00 : f32
    %14 = vector.broadcast %cst_11 : f32 to vector<8x128xf32>
    %15 = arith.maximumf %13, %14 : vector<8x128xf32>
    %16 = arith.truncf %15 : vector<8x128xf32> to vector<8x128xbf16>
    %c0_12 = arith.constant 0 : index
    %c0_13 = arith.constant 0 : index
    %17 = vector.load %arg7[%c0_12, %c0_13] : memref<128x256xbf16, #tpu.memory_space<vmem>>, vector<128x256xbf16>
    %cst_14 = arith.constant dense<0.000000e+00> : vector<8x256xf32>
    %18 = tpu.matmul %16, %17, %cst_14 {dimension_numbers = #tpu.dot_dimension_numbers<[1], [0], [0], [1], [0, 0, 1, 1], [], []>} : vector<8x128xbf16>, vector<128x256xbf16>, vector<8x256xf32> -> vector<8x256xf32>
    %c0_15 = arith.constant 0 : index
    %c0_16 = arith.constant 0 : index
    %19 = vector.load %arg8[%c0_15, %c0_16] : memref<1x256xf32, #tpu.memory_space<vmem>>, vector<1x256xf32>
    %20 = vector.broadcast %19 : vector<1x256xf32> to vector<8x256xf32>
    %21 = arith.addf %18, %20 : vector<8x256xf32>
    %22 = vector.extract_strided_slice %21 {offsets = [0, 0], sizes = [8, 128], strides = [1, 1]} : vector<8x256xf32> to vector<8x128xf32>
    %23 = vector.extract_strided_slice %21 {offsets = [0, 128], sizes = [8, 128], strides = [1, 1]} : vector<8x256xf32> to vector<8x128xf32>
    %c0_17 = arith.constant 0 : index
    %c0_18 = arith.constant 0 : index
    %24 = vector.load %arg2[%c0_17, %c0_18] : memref<8x128xf32, #tpu.memory_space<vmem>>, vector<8x128xf32>
    %cst_19 = arith.constant 5.000000e-01 : f32
    %25 = vector.broadcast %cst_19 : f32 to vector<8x128xf32>
    %26 = arith.mulf %25, %23 : vector<8x128xf32>
    %27 = math.exp %26 : vector<8x128xf32>
    %28 = arith.mulf %24, %27 : vector<8x128xf32>
    %29 = arith.addf %22, %28 : vector<8x128xf32>
    %30 = arith.truncf %29 : vector<8x128xf32> to vector<8x128xbf16>
    %c0_20 = arith.constant 0 : index
    %c0_21 = arith.constant 0 : index
    %31 = vector.load %arg9[%c0_20, %c0_21] : memref<128x128xbf16, #tpu.memory_space<vmem>>, vector<128x128xbf16>
    %cst_22 = arith.constant dense<0.000000e+00> : vector<8x128xf32>
    %32 = tpu.matmul %30, %31, %cst_22 {dimension_numbers = #tpu.dot_dimension_numbers<[1], [0], [0], [1], [0, 0, 1, 1], [], []>} : vector<8x128xbf16>, vector<128x128xbf16>, vector<8x128xf32> -> vector<8x128xf32>
    %c0_23 = arith.constant 0 : index
    %c0_24 = arith.constant 0 : index
    %33 = vector.load %arg10[%c0_23, %c0_24] : memref<1x128xf32, #tpu.memory_space<vmem>>, vector<1x128xf32>
    %34 = vector.broadcast %33 : vector<1x128xf32> to vector<8x128xf32>
    %35 = arith.addf %32, %34 : vector<8x128xf32>
    %cst_25 = arith.constant 0.000000e+00 : f32
    %36 = vector.broadcast %cst_25 : f32 to vector<8x128xf32>
    %37 = arith.maximumf %35, %36 : vector<8x128xf32>
    %38 = arith.truncf %37 : vector<8x128xf32> to vector<8x128xbf16>
    %c0_26 = arith.constant 0 : index
    %c0_27 = arith.constant 0 : index
    %39 = vector.load %arg11[%c0_26, %c0_27] : memref<128x128xbf16, #tpu.memory_space<vmem>>, vector<128x128xbf16>
    %cst_28 = arith.constant dense<0.000000e+00> : vector<8x128xf32>
    %40 = tpu.matmul %38, %39, %cst_28 {dimension_numbers = #tpu.dot_dimension_numbers<[1], [0], [0], [1], [0, 0, 1, 1], [], []>} : vector<8x128xbf16>, vector<128x128xbf16>, vector<8x128xf32> -> vector<8x128xf32>
    %c0_29 = arith.constant 0 : index
    %c0_30 = arith.constant 0 : index
    %41 = vector.load %arg12[%c0_29, %c0_30] : memref<1x128xf32, #tpu.memory_space<vmem>>, vector<1x128xf32>
    %42 = vector.broadcast %41 : vector<1x128xf32> to vector<8x128xf32>
    %43 = arith.addf %40, %42 : vector<8x128xf32>
    %44 = arith.negf %43 : vector<8x128xf32>
    %45 = math.exp %44 : vector<8x128xf32>
    %cst_31 = arith.constant 1.000000e+00 : f32
    %46 = vector.broadcast %cst_31 : f32 to vector<8x128xf32>
    %47 = arith.addf %46, %45 : vector<8x128xf32>
    %48 = arith.divf %46, %47 : vector<8x128xf32>
    %c0_32 = arith.constant 0 : index
    %c0_33 = arith.constant 0 : index
    %49 = vector.load %arg13[%c0_32, %c0_33] : memref<8x512xf32, #tpu.memory_space<vmem>>, vector<8x128xf32>
    tpu.vector_store %arg13[%c0_32, %c0_33], %15 {strides = array<i32>} : memref<8x512xf32, #tpu.memory_space<vmem>>, vector<8x128xf32>,
    %c0_34 = arith.constant 0 : index
    %c128 = arith.constant 128 : index
    %50 = vector.load %arg13[%c0_34, %c128] : memref<8x512xf32, #tpu.memory_space<vmem>>, vector<8x256xf32>
    tpu.vector_store %arg13[%c0_34, %c128], %21 {strides = array<i32>} : memref<8x512xf32, #tpu.memory_space<vmem>>, vector<8x256xf32>,
    %c0_35 = arith.constant 0 : index
    %c384 = arith.constant 384 : index
    %51 = vector.load %arg13[%c0_35, %c384] : memref<8x512xf32, #tpu.memory_space<vmem>>, vector<8x128xf32>
    tpu.vector_store %arg13[%c0_35, %c384], %48 {strides = array<i32>} : memref<8x512xf32, #tpu.memory_space<vmem>>, vector<8x128xf32>,
    return
  }
  func.func @transform_0(%arg0: i32) -> (i32, i32) {
    %c0_i32 = arith.constant 0 : i32
    %c0_i32_0 = arith.constant 0 : i32
    return %arg0, %c0_i32 : i32, i32
  }
  func.func @transform_1(%arg0: i32) -> (i32, i32) {
    %c0_i32 = arith.constant 0 : i32
    %c0_i32_0 = arith.constant 0 : i32
    return %arg0, %c0_i32 : i32, i32
  }
  func.func @transform_2(%arg0: i32) -> (i32, i32) {
    %c0_i32 = arith.constant 0 : i32
    %c0_i32_0 = arith.constant 0 : i32
    %c0_i32_1 = arith.constant 0 : i32
    return %c0_i32, %c0_i32_0 : i32, i32
  }
  func.func @transform_3(%arg0: i32) -> (i32, i32) {
    %c0_i32 = arith.constant 0 : i32
    %c0_i32_0 = arith.constant 0 : i32
    %c0_i32_1 = arith.constant 0 : i32
    return %c0_i32, %c0_i32_0 : i32, i32
  }
  func.func @transform_4(%arg0: i32) -> (i32, i32) {
    %c0_i32 = arith.constant 0 : i32
    %c0_i32_0 = arith.constant 0 : i32
    %c0_i32_1 = arith.constant 0 : i32
    return %c0_i32, %c0_i32_0 : i32, i32
  }
  func.func @transform_5(%arg0: i32) -> (i32, i32) {
    %c0_i32 = arith.constant 0 : i32
    %c0_i32_0 = arith.constant 0 : i32
    %c0_i32_1 = arith.constant 0 : i32
    return %c0_i32, %c0_i32_0 : i32, i32
  }
  func.func @transform_6(%arg0: i32) -> (i32, i32) {
    %c0_i32 = arith.constant 0 : i32
    %c0_i32_0 = arith.constant 0 : i32
    %c0_i32_1 = arith.constant 0 : i32
    return %c0_i32, %c0_i32_0 : i32, i32
  }
  func.func @transform_7(%arg0: i32) -> (i32, i32) {
    %c0_i32 = arith.constant 0 : i32
    %c0_i32_0 = arith.constant 0 : i32
    %c0_i32_1 = arith.constant 0 : i32
    return %c0_i32, %c0_i32_0 : i32, i32
  }
  func.func @transform_8(%arg0: i32) -> (i32, i32) {
    %c0_i32 = arith.constant 0 : i32
    %c0_i32_0 = arith.constant 0 : i32
    %c0_i32_1 = arith.constant 0 : i32
    return %c0_i32, %c0_i32_0 : i32, i32
  }
  func.func @transform_9(%arg0: i32) -> (i32, i32) {
    %c0_i32 = arith.constant 0 : i32
    %c0_i32_0 = arith.constant 0 : i32
    %c0_i32_1 = arith.constant 0 : i32
    return %c0_i32, %c0_i32_0 : i32, i32
  }
  func.func @transform_10(%arg0: i32) -> (i32, i32) {
    %c0_i32 = arith.constant 0 : i32
    %c0_i32_0 = arith.constant 0 : i32
    %c0_i32_1 = arith.constant 0 : i32
    return %c0_i32, %c0_i32_0 : i32, i32
  }
  func.func @transform_11(%arg0: i32) -> (i32, i32) {
    %c0_i32 = arith.constant 0 : i32
    %c0_i32_0 = arith.constant 0 : i32
    %c0_i32_1 = arith.constant 0 : i32
    return %c0_i32, %c0_i32_0 : i32, i32
  }
  func.func @transform_12(%arg0: i32) -> (i32, i32) {
    %c0_i32 = arith.constant 0 : i32
    %c0_i32_0 = arith.constant 0 : i32
    return %arg0, %c0_i32 : i32, i32
  }
}

</mosaic_0001>

<bundles_post_ra>
// kernel: vae_forward.1
= control target key start
LH: loop header
LB: loop body
LE: loop exit
PB: predicated region body
PF: predicated region fallthrough
CT: control target
= control target key end

     0   :  { %17 = vsyncpa [#allocation3], 0  ;;  %s1337_s0 = inlined_call_operand.vmem [shape: bf16[8,128], index: 0, kind: input, shape index: {}]   ;;  %s1338_s1 = inlined_call_operand.vmem [shape: f32[8,128], index: 1, kind: input, shape index: {}]   ;;  %s1339_s2 = inlined_call_operand.vmem [shape: bf16[128,128], index: 2, kind: input, shape index: {}]   ;;  %s1340_s3 = inlined_call_operand.vmem [shape: f32[1,128], index: 3, kind: input, shape index: {}]   ;;  %s1341_s4 = inlined_call_operand.hbm [shape: bf16[128,128], index: 4, kind: input, shape index: {}]   ;;  %s1342_s5 = inlined_call_operand.hbm [shape: f32[1,128], index: 5, kind: input, shape index: {}]   ;;  %s1343_s6 = inlined_call_operand.hbm [shape: bf16[128,256], index: 6, kind: input, shape index: {}]   ;;  %s1344_s7 = inlined_call_operand.vmem [shape: f32[1,256], index: 7, kind: input, shape index: {}]   ;;  %s1345_s8 = inlined_call_operand.hbm [shape: bf16[128,128], index: 8, kind: input, shape index: {}]   ;;  %s1346_s9 = inlined_call_operand.hbm [shape: f32[1,128], index: 9, kind: input, shape index: {}]   ;;  %s1347_s10 = inlined_call_operand.hbm [shape: bf16[128,128], index: 10, kind: input, shape index: {}]   ;;  %s1348_s11 = inlined_call_operand.hbm [shape: f32[1,128], index: 11, kind: input, shape index: {}]   ;;  %s1349_s12 = inlined_call_operand.vmem [shape: f32[8,512], index: 12, kind: output, shape index: {}]  }
   0x1   :  { %18 = vsyncpa [#allocation5], 0 }
   0x2   :  { %19 = vsyncpa [#allocation8], 0 }
   0x3   :  { %20 = vsyncpa [#allocation11], 0  ;;  %s1149_s21 = smov [#allocation4]  }
   0x4   :  { %s47_s22 = sshll.u32 %s1149_s21, 4  ;;  %s48_s22 = int_to_ptr.vmem [resolvable:$true] %s47_s22 }
   0x5   :  { %s1009_s23 = scalar_lea.vmem %s48_s22, 16  ;;  %s1013_s24 = scalar_lea.vmem %s48_s22, 32 }
   0x6   :  { %p1010_p0 = scmp.ne.s32.totalorder %s48_s22, %s1009_s23  ;;  %p1014_p1 = scmp.lt.s32.totalorder %s48_s22, %s48_s22 }
   0x7   :  { %p1015_p2 = scmp.lt.s32.totalorder %s1013_s24, %s1009_s23 }
   0x9   :  { %p1016_p3 = por %p1015_p2, %p1014_p1 }
   0xb   :  { %p1017_p4 = pnand %p1016_p3, %p1010_p0 }
   0xd   :  { %1020 = shalt.err (!%p1017_p4)
}
   0xe   :  { %50 = dma.hbm_to_vmem [thread:$0]  %s1342_s5, 16, %s48_s22, [#allocation5]  }
   0xf   :  { %s1150_s27 = smov [#allocation7]   ;;  %s1151_s29 = smov [#allocation10]  }
  0x10   :  { %s70_s28 = sshll.u32 %s1150_s27, 4  ;;  %s92_s30 = sshll.u32 %s1151_s29, 4  ;;  %s71_s28 = int_to_ptr.vmem [resolvable:$true] %s70_s28  ;;  %s93_s30 = int_to_ptr.vmem [resolvable:$true] %s92_s30 }
  0x11   :  { %s1029_s13 = scalar_lea.vmem %s71_s28, 1024  ;;  %p1034_p6 = scmp.lt.s32.totalorder %s71_s28, %s71_s28 }
  0x12   :  { %p1030_p5 = scmp.ne.s32.totalorder %s71_s28, %s1029_s13  ;;  %p1035_p7 = scmp.lt.s32.totalorder %s1029_s13, %s1029_s13 }
  0x14   :  { %p1036_p8 = por %p1035_p7, %p1034_p6 }
  0x16   :  { %p1037_p9 = pnand %p1036_p8, %p1030_p5 }
  0x18   :  { %1040 = shalt.err (!%p1037_p9)
}
  0x19   :  { %s1152_s14 = smov 64   ;;  %s1153_s15 = smov 4  }
  0x1a   :  { %76 = dma.hbm_to_vmem [thread:$0]  %s1345_s8, 1024, %s71_s28, [#allocation8], %s1152_s14, %s1152_s14, %s1153_s15  }
  0x1b   :  { %s1049_s5 = scalar_lea.vmem %s93_s30, 1024  ;;  %p1054_p11 = scmp.lt.s32.totalorder %s93_s30, %s93_s30 }
  0x1c   :  { %p1050_p10 = scmp.ne.s32.totalorder %s93_s30, %s1049_s5  ;;  %p1055_p12 = scmp.lt.s32.totalorder %s1049_s5, %s1049_s5 }
  0x1e   :  { %p1056_p13 = por %p1055_p12, %p1054_p11 }
  0x20   :  { %p1057_p0 = pnand %p1056_p13, %p1050_p10 }
  0x22   :  { %1060 = shalt.err (!%p1057_p0)
}
  0x23   :  { %98 = dma.hbm_to_vmem [thread:$0]  %s1347_s10, 1024, %s93_s30, [#allocation11], %s1152_s14, %s1152_s14, %s1153_s15  }
  0x24   :  { %s1154_s20 = smov [#allocation2]   ;;  %s1155_s22 = smov [#allocation6]  }
  0x25   :  { %s34_s21 = sshll.u32 %s1154_s20, 4  ;;  %s56_s23 = sshll.u32 %s1155_s22, 4  ;;  %s35_s21 = int_to_ptr.vmem [resolvable:$true] %s34_s21  ;;  %s57_s23 = int_to_ptr.vmem [resolvable:$true] %s56_s23 }
  0x26   :  { %s1069_s24 = scalar_lea.vmem %s35_s21, 1024  ;;  %p1074_p2 = scmp.lt.s32.totalorder %s35_s21, %s35_s21 }
  0x27   :  { %p1070_p1 = scmp.ne.s32.totalorder %s35_s21, %s1069_s24  ;;  %p1075_p3 = scmp.lt.s32.totalorder %s1069_s24, %s1069_s24 }
  0x29   :  { %p1076_p4 = por %p1075_p3, %p1074_p2 }
  0x2b   :  { %p1077_p5 = pnand %p1076_p4, %p1070_p1 }
  0x2d   :  { %1080 = shalt.err (!%p1077_p5)
}
  0x2e   :  { %40 = dma.hbm_to_vmem [thread:$0]  %s1341_s4, 1024, %s35_s21, [#allocation3], %s1152_s14, %s1152_s14, %s1153_s15  }
  0x2f   :  { %s1089_s26 = scalar_lea.vmem %s57_s23, 2048  ;;  %p1094_p7 = scmp.lt.s32.totalorder %s57_s23, %s57_s23 }
  0x30   :  { %p1090_p6 = scmp.ne.s32.totalorder %s57_s23, %s1089_s26  ;;  %p1095_p8 = scmp.lt.s32.totalorder %s1089_s26, %s1089_s26 }
  0x32   :  { %p1096_p9 = por %p1095_p8, %p1094_p7 }
  0x34   :  { %p1097_p10 = pnand %p1096_p9, %p1090_p6 }
  0x36   :  { %1100 = shalt.err (!%p1097_p10)
}
  0x37   :  { %s1156_s10 = smov 128   ;;  %s1157_s27 = smov 8  }
  0x38   :  { %62 = dma.hbm_to_vmem [thread:$0]  %s1343_s6, 2048, %s57_s23, [#allocation5], %s1156_s10, %s1156_s10, %s1157_s27  }
  0x39   :  { %s1158_s30 = smov [#allocation9]   ;;  %s1159_s16 = smov [#allocation12]  }
  0x3a   :  { %s83_s13 = sshll.u32 %s1158_s30, 4  ;;  %s105_s17 = sshll.u32 %s1159_s16, 4  ;;  %s84_s13 = int_to_ptr.vmem [resolvable:$true] %s83_s13  ;;  %s106_s17 = int_to_ptr.vmem [resolvable:$true] %s105_s17 }
  0x3b   :  { %s1109_s4 = scalar_lea.vmem %s84_s13, 16  ;;  %s1113_s14 = scalar_lea.vmem %s84_s13, 32 }
  0x3c   :  { %p1110_p11 = scmp.ne.s32.totalorder %s84_s13, %s1109_s4  ;;  %p1114_p12 = scmp.lt.s32.totalorder %s84_s13, %s84_s13 }
  0x3d   :  { %p1115_p13 = scmp.lt.s32.totalorder %s1113_s14, %s1109_s4 }
  0x3f   :  { %p1116_p0 = por %p1115_p13, %p1114_p12 }
  0x41   :  { %p1117_p1 = pnand %p1116_p0, %p1110_p11 }
  0x43   :  { %1120 = shalt.err (!%p1117_p1)
}
  0x44   :  { %86 = dma.hbm_to_vmem [thread:$0]  %s1346_s9, 16, %s84_s13, [#allocation8]  }
  0x45   :  { %s1129_s18 = scalar_lea.vmem %s106_s17, 16  ;;  %s1133_s6 = scalar_lea.vmem %s106_s17, 32 }
  0x46   :  { %p1130_p2 = scmp.ne.s32.totalorder %s106_s17, %s1129_s18  ;;  %p1134_p3 = scmp.lt.s32.totalorder %s106_s17, %s106_s17 }
  0x47   :  { %p1135_p4 = scmp.lt.s32.totalorder %s1133_s6, %s1129_s18 }
  0x49   :  { %p1136_p5 = por %p1135_p4, %p1134_p3 }
  0x4b   :  { %p1137_p6 = pnand %p1136_p5, %p1130_p2 }
  0x4d   :  { %1140 = shalt.err (!%p1137_p6)
}
  0x4e   :  { %108 = dma.hbm_to_vmem [thread:$0]  %s1348_s11, 16, %s106_s17, [#allocation11]  }
  0x4f   :  { %1141 = dma.done.wait [#allocation3], 1024  }
  0x50   :  { %1142 = vsyncadd [#allocation3], 4294966272 }
  0x51   :  { %1143 = dma.done.wait [#allocation5], 2064  }
  0x52   :  { %1144 = vsyncadd [#allocation5], 4294965232 }
  0x53   :  { %1145 = dma.done.wait [#allocation8], 1040  }
  0x54   :  { %1146 = vsyncadd [#allocation8], 4294966256 }
  0x55   :  { %1147 = dma.done.wait [#allocation11], 1040  }
  0x56   :  { %1148 = vsyncadd [#allocation11], 4294966256  ;;  %v1160_v0 = vmov 0.0   ;;  %vm1161_vm0 = vmmov 0   ;;  %v939_v1 = vld [vmem:[%s1339_s2 + $0x38] sm:$0xff]   ;;  %v940_v2 = vld [vmem:[%s1339_s2 + $0x30] sm:$0xff]  }
  0x57   :  { %845 = vmatprep.subr.bf16.mxu0 %v1160_v0  ;;  %861 = vmatprep.mubr.msk.bf16.mxu0 %vm1161_vm0, %v1160_v0  ;;  %v941_v3 = vld [vmem:[%s1339_s2 + $0x28] sm:$0xff]   ;;  %v947_v4 = vld [vmem:[#allocation2 + $0x38] sm:$0xff]   ;;  %v942_v5 = vld [vmem:[%s1339_s2 + $0x20] sm:$0xff]   ;;  %v1162_v42 = vmov 0  }
  0x58   :  { %865 = vmatprep.subr.bf16.mxu1 %v1160_v0  ;;  %881 = vmatprep.mubr.msk.bf16.mxu1 %vm1161_vm0, %v1160_v0  ;;  %v948_v6 = vld [vmem:[#allocation2 + $0x30] sm:$0xff]   ;;  %v943_v7 = vld [vmem:[%s1339_s2 + $0x18] sm:$0xff]   ;;  %v949_v8 = vld [vmem:[#allocation2 + $0x28] sm:$0xff]  }
  0x59   :  { %846 = vmatpush3.bf16.msra.mxu0 %v939_v1  ;;  %866 = vmatpush3.bf16.msra.mxu1 %v947_v4  ;;  %v944_v9 = vld [vmem:[%s1339_s2 + $0x10] sm:$0xff]   ;;  %v950_v10 = vld [vmem:[#allocation2 + $0x20] sm:$0xff]   ;;  %v945_v11 = vld [vmem:[%s1339_s2 + $0x8] sm:$0xff]  }
  0x5a   :  { %847 = vmatprep.subr.bf16.mxu0 %v1160_v0  ;;  %867 = vmatprep.subr.bf16.mxu1 %v1160_v0  ;;  %v951_v12 = vld [vmem:[#allocation2 + $0x18] sm:$0xff]   ;;  %v946_v13 = vld [vmem:[%s1339_s2] sm:$0xff]   ;;  %v952_v14 = vld [vmem:[#allocation2 + $0x10] sm:$0xff]  }
  0x5b   :  { %v131_v15 = vld [vmem:[%s1337_s0] sm:$0xf]  ;;  %v953_v16 = vld [vmem:[#allocation2 + $0x8] sm:$0xff]   ;;  %v955_v18 = vld [vmem:[#allocation6 + $0x70] ss:$8 sps:$4 sm:$0xff]  }
  0x5c   :  { %v954_v17 = vld [vmem:[#allocation2] sm:$0xff]   ;;  %v961_v23 = vld [vmem:[#allocation6 + $0x50] ss:$8 sps:$4 sm:$0xff]   ;;  %v981_v53 = vld [vmem:[#allocation7 + $0x28] sm:$0xff]  }
  0x5d   :  { %848 = vmatpush3.bf16.msra.mxu0 %v940_v2  ;;  %868 = vmatpush3.bf16.msra.mxu1 %v948_v6  ;;  %v957_v19 = vld [vmem:[#allocation6 + $0x74] ss:$8 sps:$4 sm:$0xff]   ;;  %v960_v20 = vld [vmem:[#allocation6 + $0x64] ss:$8 sps:$4 sm:$0xff]   ;;  %v958_v21 = vld [vmem:[#allocation6 + $0x60] ss:$8 sps:$4 sm:$0xff]   ;;  %v376_v2 = vlaneseq }
  0x5e   :  { %849 = vmatprep.subr.bf16.mxu0 %v1160_v0  ;;  %869 = vmatprep.subr.bf16.mxu1 %v1160_v0  ;;  %v963_v22 = vld [vmem:[#allocation6 + $0x54] ss:$8 sps:$4 sm:$0xff]   ;;  %v966_v24 = vld [vmem:[#allocation6 + $0x44] ss:$8 sps:$4 sm:$0xff]   ;;  %v964_v25 = vld [vmem:[#allocation6 + $0x40] ss:$8 sps:$4 sm:$0xff]  }
  0x5f   :  { %v969_v26 = vld [vmem:[#allocation6 + $0x34] ss:$8 sps:$4 sm:$0xff]   ;;  %v967_v27 = vld [vmem:[#allocation6 + $0x30] ss:$8 sps:$4 sm:$0xff]   ;;  %v972_v28 = vld [vmem:[#allocation6 + $0x24] ss:$8 sps:$4 sm:$0xff]  }
  0x60   :  { %v970_v29 = vld [vmem:[#allocation6 + $0x20] ss:$8 sps:$4 sm:$0xff]   ;;  %v975_v30 = vld [vmem:[#allocation6 + $0x14] ss:$8 sps:$4 sm:$0xff]   ;;  %v973_v31 = vld [vmem:[#allocation6 + $0x10] ss:$8 sps:$4 sm:$0xff]  }
  0x61   :  { %850 = vmatpush3.bf16.msra.mxu0 %v941_v3  ;;  %870 = vmatpush3.bf16.msra.mxu1 %v949_v8  ;;  %v756_v32 = vld [vmem:[%s1340_s3] ss:$0 sm:$0xff]  ;;  %v978_v40 = vld [vmem:[#allocation6 + $0x4] ss:$8 sps:$4 sm:$0xff]   ;;  %v976_v41 = vld [vmem:[#allocation6] ss:$8 sps:$4 sm:$0xff]  }
  0x62   :  { %851 = vmatprep.subr.bf16.mxu0 %v1160_v0  ;;  %871 = vmatprep.subr.bf16.mxu1 %v1160_v0  ;;  %v979_v43 = vld [vmem:[#allocation7 + $0x38] sm:$0xff]   ;;  %v980_v52 = vld [vmem:[#allocation7 + $0x30] sm:$0xff]   ;;  %v982_v54 = vld [vmem:[#allocation7 + $0x20] sm:$0xff]   ;;  %v377_v3 = vshrl.u32 %v376_v2, 7 }
  0x63   :  { %v765_v44 = vld [vmem:[#allocation4] ss:$0 sm:$0xff]  ;;  %v984_v56 = vld [vmem:[#allocation7 + $0x10] sm:$0xff]   ;;  %v985_v57 = vld [vmem:[#allocation7 + $0x8] sm:$0xff]  }
  0x64   :  { %v983_v55 = vld [vmem:[#allocation7 + $0x18] sm:$0xff]   ;;  %v986_v58 = vld [vmem:[#allocation7] sm:$0xff]   ;;  %v989_v61 = vld [vmem:[#allocation10 + $0x28] sm:$0xff]   ;;  %v378_v4 = vsub.s32 0, %v377_v3  ;;  %v382_v6 = vsub.s32 1, %v377_v3 }
  0x65   :  { %852 = vmatpush3.bf16.msra.mxu0 %v942_v5  ;;  %872 = vmatpush3.bf16.msra.mxu1 %v950_v10  ;;  %v987_v59 = vld [vmem:[#allocation10 + $0x38] sm:$0xff]   ;;  %v988_v60 = vld [vmem:[#allocation10 + $0x30] sm:$0xff]   ;;  %v990_v62 = vld [vmem:[#allocation10 + $0x20] sm:$0xff]  }
  0x66   :  { %853 = vmatprep.subr.bf16.mxu0 %v1160_v0  ;;  %873 = vmatprep.subr.bf16.mxu1 %v1160_v0  ;;  %v991_v63 = vld [vmem:[#allocation10 + $0x18] sm:$0xff]   ;;  %v992_v1 = vld [vmem:[#allocation10 + $0x10] sm:$0xff]  }
  0x67   :  { %v374_v5 = vld [vmem:[%s1344_s7] sm:$0x3] }
  0x68   :  { %v383_v8 = vrot.slane %v374_v5, %v382_v6 }
  0x69   :  { %854 = vmatpush3.bf16.msra.mxu0 %v943_v7  ;;  %874 = vmatpush3.bf16.msra.mxu1 %v951_v12  ;;  %v379_v7 = vrot.slane %v374_v5, %v378_v4 }
  0x6a   :  { %855 = vmatprep.subr.bf16.mxu0 %v1160_v0  ;;  %875 = vmatprep.subr.bf16.mxu1 %v1160_v0 }
  0x6d   :  { %856 = vmatpush3.bf16.msra.mxu0 %v944_v9  ;;  %876 = vmatpush3.bf16.msra.mxu1 %v952_v14 }
  0x6e   :  { %857 = vmatprep.subr.bf16.mxu0 %v1160_v0  ;;  %877 = vmatprep.subr.bf16.mxu1 %v1160_v0 }
  0x71   :  { %858 = vmatpush3.bf16.msra.mxu0 %v945_v11  ;;  %878 = vmatpush3.bf16.msra.mxu1 %v953_v16 }
  0x72   :  { %859 = vmatprep.subr.bf16.mxu0 %v1160_v0  ;;  %879 = vmatprep.subr.bf16.mxu1 %v1160_v0 }
  0x75   :  { %860 = vmatpush3.bf16.msra.mxu0 %v946_v13  ;;  %880 = vmatpush3.bf16.msra.mxu1 %v954_v17  ;;  %v507_v17 = vld [vmem:[%s1338_s1] sm:$0xff] }
  0x76   :  { %885 = vmatprep.subr.bf16.mxu1 %v1160_v0  ;;  %466 = vmatprep.subr.bf16.mxu0 %v957_v19 }
  0x78   :  { %862 = vmatmul.mubr.bf16.vlgmr.msra.gmra.mxu0 %v131_v15 }
  0x79   :  { %467 = vmatpush1.bf16.msra.mxu0 %v955_v18  ;;  %498 = vmatprep.mubr.bf16.mxu0 %v1162_v42 }
  0x7a   :  { %468 = vmatprep.subr.bf16.mxu0 %v960_v20 }
  0x7d   :  { %469 = vmatpush1.bf16.msra.mxu0 %v958_v21 }
  0x7e   :  { %470 = vmatprep.subr.bf16.mxu0 %v963_v22  ;;  %v993_v22 = vld [vmem:[#allocation10 + $0x8] sm:$0xff]  }
  0x81   :  { %471 = vmatpush1.bf16.msra.mxu0 %v961_v23  ;;  %v994_v23 = vld [vmem:[#allocation10] sm:$0xff]  }
  0x82   :  { %472 = vmatprep.subr.bf16.mxu0 %v966_v24  ;;  %v790_v24 = vld [vmem:[#allocation9] ss:$0 sm:$0xff] }
  0x85   :  { %473 = vmatpush1.bf16.msra.mxu0 %v964_v25 }
  0x86   :  { %474 = vmatprep.subr.bf16.mxu0 %v969_v26 }
  0x89   :  { %475 = vmatpush1.bf16.msra.mxu0 %v967_v27 }
  0x8a   :  { %476 = vmatprep.subr.bf16.mxu0 %v972_v28 }
  0x8d   :  { %477 = vmatpush1.bf16.msra.mxu0 %v970_v29 }
  0x8e   :  { %478 = vmatprep.subr.bf16.mxu0 %v975_v30 }
  0x91   :  { %479 = vmatpush1.bf16.msra.mxu0 %v973_v31 }
  0x92   :  { %480 = vmatprep.subr.bf16.mxu0 %v978_v40 }
  0x95   :  { %481 = vmatpush1.bf16.msra.mxu0 %v976_v41 }
  0x96   :  { %905 = vmatprep.subr.bf16.mxu0 %v1160_v0 }
 0x138   :  { %v237_v33 = vpop.f32.mrf.mxu0 }
 0x139   :  { %v238_v34 = vadd.f32 %v756_v32, %v237_v33  ;;  %v799_v32 = vld [vmem:[#allocation12] ss:$0 sm:$0xff] }
 0x13a   :  { %v863_v35 = vpop.f32.mrf.mxu0 }
 0x13b   :  { %v243_v36 = vmax.f32 %v238_v34, 0.0 }
 0x13c   :  { %v240_v37 = vpop.f32.mrf.mxu0 }
 0x13d   :  { %v244_v38 = vpack.c.bf16 %v243_v36, %v243_v36 }
 0x13e   :  { %v864_v39 = vpop.f32.mrf.mxu0 }
 0x13f   :  { %882 = vmatmul.mubr.bf16.vlgmr.msra.gmra.mxu1 %v244_v38 }
 0x140   :  { %901 = vmatprep.mubr.msk.bf16.mxu1 %vm1161_vm0, %v1160_v0  ;;  %886 = vmatpush3.bf16.msra.mxu1 %v979_v43 }
 0x141   :  { %887 = vmatprep.subr.bf16.mxu1 %v1160_v0 }
 0x144   :  { %888 = vmatpush3.bf16.msra.mxu1 %v980_v52 }
 0x145   :  { %889 = vmatprep.subr.bf16.mxu1 %v1160_v0 }
 0x148   :  { %890 = vmatpush3.bf16.msra.mxu1 %v981_v53 }
 0x149   :  { %891 = vmatprep.subr.bf16.mxu1 %v1160_v0 }
 0x14c   :  { %892 = vmatpush3.bf16.msra.mxu1 %v982_v54 }
 0x14d   :  { %893 = vmatprep.subr.bf16.mxu1 %v1160_v0 }
 0x150   :  { %894 = vmatpush3.bf16.msra.mxu1 %v983_v55 }
 0x151   :  { %895 = vmatprep.subr.bf16.mxu1 %v1160_v0 }
 0x154   :  { %896 = vmatpush3.bf16.msra.mxu1 %v984_v56 }
 0x155   :  { %897 = vmatprep.subr.bf16.mxu1 %v1160_v0 }
 0x158   :  { %898 = vmatpush3.bf16.msra.mxu1 %v985_v57 }
 0x159   :  { %899 = vmatprep.subr.bf16.mxu1 %v1160_v0 }
 0x15c   :  { %900 = vmatpush3.bf16.msra.mxu1 %v986_v58 }
 0x1ff   :  { %v350_v45 = vpop.f32.mrf.mxu1 }
 0x200   :  { %v351_v46 = vadd.f32 %v765_v44, %v350_v45 }
 0x201   :  { %v883_v47 = vpop.f32.mrf.mxu1 }
 0x202   :  { %v356_v48 = vmax.f32 %v351_v46, 0.0 }
 0x203   :  { %v353_v49 = vpop.f32.mrf.mxu1 }
 0x204   :  { %v357_v50 = vpack.c.bf16 %v356_v48, %v356_v48  ;;  %744 = vst [vmem:[%s1349_s12] sm:$0xff] %v356_v48 }
 0x205   :  { %v884_v51 = vpop.f32.mrf.mxu1 }
 0x206   :  { %499 = vmatmul.mubr.bf16.vlgmr.msra.gmra.mxu0 %v357_v50 }
 0x207   :  { %921 = vmatprep.mubr.msk.bf16.mxu0 %vm1161_vm0, %v1160_v0  ;;  %906 = vmatpush3.bf16.msra.mxu0 %v987_v59 }
 0x208   :  { %907 = vmatprep.subr.bf16.mxu0 %v1160_v0 }
 0x20b   :  { %908 = vmatpush3.bf16.msra.mxu0 %v988_v60 }
 0x20c   :  { %909 = vmatprep.subr.bf16.mxu0 %v1160_v0 }
 0x20f   :  { %910 = vmatpush3.bf16.msra.mxu0 %v989_v61 }
 0x210   :  { %911 = vmatprep.subr.bf16.mxu0 %v1160_v0 }
 0x213   :  { %912 = vmatpush3.bf16.msra.mxu0 %v990_v62 }
 0x214   :  { %913 = vmatprep.subr.bf16.mxu0 %v1160_v0 }
 0x217   :  { %914 = vmatpush3.bf16.msra.mxu0 %v991_v63 }
 0x218   :  { %915 = vmatprep.subr.bf16.mxu0 %v1160_v0 }
 0x21b   :  { %916 = vmatpush3.bf16.msra.mxu0 %v992_v1 }
 0x21c   :  { %917 = vmatprep.subr.bf16.mxu0 %v1160_v0 }
 0x21f   :  { %918 = vmatpush3.bf16.msra.mxu0 %v993_v22 }
 0x220   :  { %919 = vmatprep.subr.bf16.mxu0 %v1160_v0 }
 0x223   :  { %920 = vmatpush3.bf16.msra.mxu0 %v994_v23 }
 0x2c6   :  { %v500_v9 = vpop.f32.mrf.mxu0 }
 0x2c7   :  { %v501_v10 = vadd.f32 %v500_v9, %v379_v7 }
 0x2c8   :  { %v502_v11 = vpop.f32.mrf.mxu0 }
 0x2c9   :  { %745 = vst [vmem:[%s1349_s12 + $0x8] sm:$0xff] %v501_v10  ;;  %v503_v12 = vadd.f32 %v502_v11, %v383_v8 }
 0x2ca   :  { %v504_v13 = vpop.f32.mrf.mxu0 }
 0x2cb   :  { %v508_v14 = vmul.f32 0.5, %v503_v12  ;;  %746 = vst [vmem:[%s1349_s12 + $0x10] sm:$0xff] %v503_v12 }
 0x2cc   :  { %v505_v15 = vpop.f32.mrf.mxu0 }
 0x2cd   :  { %v509_v16 = vmul.f32 1.442695, %v508_v14 }
 0x2cf   :  { %995 = vpow2.f32 %v509_v16 }
 0x2dc   :  { %v996_v18 = vpop.eup %995 }
 0x2dd   :  { %v511_v19 = vmul.f32 %v996_v18, %v507_v17 }
 0x2df   :  { %v512_v20 = vadd.f32 %v511_v19, %v501_v10 }
 0x2e1   :  { %v513_v21 = vpack.c.bf16 %v512_v20, %v512_v20 }
 0x2e3   :  { %902 = vmatmul.mubr.bf16.vlgmr.msra.gmra.mxu1 %v513_v21 }
 0x3a3   :  { %v619_v25 = vpop.f32.mrf.mxu1 }
 0x3a4   :  { %v620_v26 = vadd.f32 %v790_v24, %v619_v25 }
 0x3a5   :  { %v903_v27 = vpop.f32.mrf.mxu1 }
 0x3a6   :  { %v625_v28 = vmax.f32 %v620_v26, 0.0 }
 0x3a7   :  { %v622_v29 = vpop.f32.mrf.mxu1 }
 0x3a8   :  { %v626_v30 = vpack.c.bf16 %v625_v28, %v625_v28 }
 0x3a9   :  { %v904_v31 = vpop.f32.mrf.mxu1 }
 0x3aa   :  { %922 = vmatmul.mubr.bf16.vlgmr.msra.gmra.mxu0 %v626_v30 }
 0x46a   :  { %v732_v33 = vpop.f32.mrf.mxu0 }
 0x46b   :  { %v733_v34 = vadd.f32 %v799_v32, %v732_v33 }
 0x46c   :  { %v923_v35 = vpop.f32.mrf.mxu0 }
 0x46d   :  { %v808_v36 = vmul.f32 -1.442695, %v733_v34 }
 0x46e   :  { %v735_v37 = vpop.f32.mrf.mxu0 }
 0x46f   :  { %997 = vpow2.f32 %v808_v36 }
 0x470   :  { %v924_v38 = vpop.f32.mrf.mxu0 }
 0x47c   :  { %v998_v0 = vpop.eup %997 }
 0x47d   :  { %v741_v39 = vadd.f32 1.0, %v998_v0 }
 0x47f   :  { %999 = vrcp.f32 %v741_v39 }
 0x48c   :  { %v1000_v40 = vpop.eup %999 }
 0x48d   :  { %747 = vst [vmem:[%s1349_s12 + $0x18] sm:$0xff] %v1000_v40 }
 0x48e   :  { %752 = vsyncpa [#allocation3], 1 }
 0x48f   :  { %753 = vsyncpa [#allocation5], 1 }
 0x490   :  { %754 = vsyncpa [#allocation8], 1 }
 0x491   :  { %755 = vsyncpa [#allocation11], 1 }

</bundles_post_ra>
